<compile_context>
chip_gen: v7x
topology: tpu7x:2x2x1
jax: 0.10.0
libtpu: 0.0.40
codegen_flags: <defaults>
</compile_context>

<pallas_src>
import functools
import math

import jax
import jax.numpy as jnp
from jax.experimental import pallas as pl
from jax.experimental.pallas import tpu as pltpu

_SUBLANE = 8  # vreg sublane width (second-to-last dim)


def _round_up(x, m):
    return (x + m - 1) // m * m


def _cdiv(a, b):
    return -(-a // b)


def _mlp_kernel(*refs, n_layers):
    """Fused MLP body.

    refs = (x_ref, w1, b1, w2, b2, ..., wL, bL, o_ref).
    Hidden activations live in vregs/VMEM for the whole chain.  Dots run in
    bf16 with f32 accumulation; bias-add / ReLU stay in f32 (v5e-safe).
    """
    x_ref = refs[0]
    o_ref = refs[-1]
    h = x_ref[...]                                     # bf16 (tile_rows, in)
    for i in range(n_layers):
        w = refs[1 + 2 * i][...]                       # bf16 (din, dout)
        b = refs[2 + 2 * i][...]                       # f32  (1, dout)
        h = jnp.dot(h.astype(jnp.bfloat16), w,
                    preferred_element_type=jnp.float32) + b
        if i < n_layers - 1:
            h = jnp.maximum(h, 0.0)
    o_ref[...] = h.astype(o_ref.dtype)


def init_mlp_params(key, input_dim, hidden_dim, output_dim, n_layers):
    """Torch-style nn.Linear init, stored transposed (in, out) as bf16
    weights and f32 (1, out) biases (no padding needed)."""
    h = [hidden_dim] * (n_layers - 1)
    dims_in = [input_dim] + h
    dims_out = h + [output_dim]
    params = []
    for din, dout in zip(dims_in, dims_out):
        key, kw, kb = jax.random.split(key, 3)
        bound = 1.0 / math.sqrt(din)
        w = jax.random.uniform(kw, (din, dout), jnp.float32, -bound, bound)
        b = jax.random.uniform(kb, (1, dout), jnp.float32, -bound, bound)
        params.append((w.astype(jnp.bfloat16), b))
    return params


def mlp_forward(x, params, *, tile_n=1024):
    """Matches torch MLP.forward: relu after every layer except the last.

    x: (..., input_dim). params: per-layer (w_bf16, b_f32) from init_mlp_params.
    """
    orig_shape = x.shape
    in_dim = orig_shape[-1]
    out_dim = params[-1][0].shape[1]
    n_layers = len(params)

    x2 = x.reshape(-1, in_dim)
    n = x2.shape[0]

    # --- Row tiling ---------------------------------------------------------
    n_pad8 = _round_up(max(n, 1), _SUBLANE)
    tile_req = _round_up(max(_SUBLANE, min(tile_n, n_pad8)), _SUBLANE)
    grid = _cdiv(n_pad8, tile_req)
    if grid == 1 and n_pad8 >= 2 * _SUBLANE:
        grid = 2                       # v7x: keep both TensorCores busy
    tile_rows = _round_up(_cdiv(n_pad8, grid), _SUBLANE)
    n_full = grid * tile_rows          # waste <= ~8 rows per grid step

    # Row pad + bf16 cast fused in one wrapper pass (halves kernel input bytes).
    x_p = jnp.zeros((n_full, in_dim), jnp.bfloat16).at[:n, :].set(
        x2.astype(jnp.bfloat16))

    in_specs = [pl.BlockSpec((tile_rows, in_dim), lambda i: (i, 0))]
    flat_params = []
    for (w, b) in params:
        # Full-array blocks with constant index_map: resident across grid steps.
        in_specs.append(pl.BlockSpec(w.shape, lambda i: (0, 0)))
        in_specs.append(pl.BlockSpec(b.shape, lambda i: (0, 0)))
        flat_params += [w, b]

    # --- VMEM budget (double-buffered x/out tiles + weights + f32 hidden) ---
    out_bytes_el = jnp.dtype(x.dtype).itemsize
    max_feat = max(w.shape[1] for (w, _) in params)
    x_tile_bytes = 2 * tile_rows * in_dim * 2
    o_tile_bytes = 2 * tile_rows * out_dim * out_bytes_el
    w_bytes = sum(w.size * 2 + b.size * 4 for (w, b) in params)
    act_bytes = 3 * tile_rows * max_feat * 4       # f32 h + bf16 copy + slack
    budget = x_tile_bytes + o_tile_bytes + 2 * w_bytes + act_bytes + (4 << 20)
    try:
        vmem_cap = pltpu.get_tpu_info().vmem_capacity_bytes
    except Exception:
        vmem_cap = 64 << 20            # v7x per-TC physical (smallest gen)
    vmem_limit = min(max(budget, 16 << 20), (vmem_cap * 3) // 4)

    flops = 2 * n_full * sum(w.shape[0] * w.shape[1] for (w, _) in params)
    bytes_accessed = (n_full * in_dim * 2
                      + n_full * out_dim * out_bytes_el + w_bytes)

    out = pl.pallas_call(
        functools.partial(_mlp_kernel, n_layers=n_layers),
        out_shape=jax.ShapeDtypeStruct((n_full, out_dim), x.dtype),
        grid=(grid,),
        in_specs=in_specs,
        out_specs=pl.BlockSpec((tile_rows, out_dim), lambda i: (i, 0)),
        compiler_params=pltpu.CompilerParams(
            dimension_semantics=("parallel",),
            vmem_limit_bytes=vmem_limit,
        ),
        cost_estimate=pl.CostEstimate(
            flops=flops, transcendentals=0, bytes_accessed=bytes_accessed),
    )(x_p, *flat_params)

    if n_full != n:
        out = out[:n]
    return out.reshape(*orig_shape[:-1], out_dim)


def mlp_reference(x, params):
    """Plain-JAX reference emulating the kernel's bf16-matmul / f32-acc path."""
    n_layers = len(params)
    h = x
    for i, (w, b) in enumerate(params):
        h = jnp.dot(h.astype(jnp.bfloat16), w,
                    preferred_element_type=jnp.float32) + b[0]
        if i < n_layers - 1:
            h = jnp.maximum(h, 0.0)
    return h.astype(x.dtype)


if __name__ == "__main__":
    input_dim, hidden_dim, output_dim, n_layers = 32, 32, 16, 3
    batch, seq = 2, 8

    key = jax.random.PRNGKey(0)
    key, kx = jax.random.split(key)
    x = jax.random.normal(kx, (batch, seq, input_dim), jnp.float32)

    params = init_mlp_params(key, input_dim, hidden_dim, output_dim, n_layers)

    out = mlp_forward(x, params)
    out = jax.block_until_ready(out)

    ref = mlp_reference(x, params)
    assert out.shape == (batch, seq, output_dim), out.shape
    assert jnp.allclose(out, ref, atol=2e-3, rtol=2e-3), float(
        jnp.max(jnp.abs(out - ref)))

    print("KERNEL_OK")
</pallas_src>

<mosaic_0001>
module attributes {stable_mosaic.version = 11 : i64} {
  func.func @_mlp_kernel(%arg0: i32, %arg1: memref<8x32xbf16, #tpu.memory_space<vmem>>, %arg2: memref<32x32xbf16, #tpu.memory_space<vmem>>, %arg3: memref<1x32xf32, #tpu.memory_space<vmem>>, %arg4: memref<32x32xbf16, #tpu.memory_space<vmem>>, %arg5: memref<1x32xf32, #tpu.memory_space<vmem>>, %arg6: memref<32x16xbf16, #tpu.memory_space<vmem>>, %arg7: memref<1x16xf32, #tpu.memory_space<vmem>>, %arg8: memref<8x16xf32, #tpu.memory_space<vmem>>) attributes {dimension_semantics = [#tpu.dimension_semantics<parallel>], iteration_bounds = array<i64: 2>, scalar_prefetch = 0 : i64, scratch_operands = 0 : i64, tpu.core_type = #tpu.core_type<tc>, window_params = [{transform_indices = @transform_0, window_bounds = array<i64: 8, 32>}, {pipeline_mode = #tpu.pipeline_mode<synchronous>, transform_indices = @transform_1, window_bounds = array<i64: 32, 32>}, {pipeline_mode = #tpu.pipeline_mode<synchronous>, transform_indices = @transform_2, window_bounds = array<i64: 1, 32>}, {pipeline_mode = #tpu.pipeline_mode<synchronous>, transform_indices = @transform_3, window_bounds = array<i64: 32, 32>}, {pipeline_mode = #tpu.pipeline_mode<synchronous>, transform_indices = @transform_4, window_bounds = array<i64: 1, 32>}, {pipeline_mode = #tpu.pipeline_mode<synchronous>, transform_indices = @transform_5, window_bounds = array<i64: 32, 16>}, {pipeline_mode = #tpu.pipeline_mode<synchronous>, transform_indices = @transform_6, window_bounds = array<i64: 1, 16>}, {transform_indices = @transform_7, window_bounds = array<i64: 8, 16>}]} {
    %c0 = arith.constant 0 : index
    %c0_0 = arith.constant 0 : index
    %0 = vector.load %arg1[%c0, %c0_0] : memref<8x32xbf16, #tpu.memory_space<vmem>>, vector<8x32xbf16>
    %c0_1 = arith.constant 0 : index
    %c0_2 = arith.constant 0 : index
    %1 = vector.load %arg2[%c0_1, %c0_2] : memref<32x32xbf16, #tpu.memory_space<vmem>>, vector<32x32xbf16>
    %c0_3 = arith.constant 0 : index
    %c0_4 = arith.constant 0 : index
    %2 = vector.load %arg3[%c0_3, %c0_4] : memref<1x32xf32, #tpu.memory_space<vmem>>, vector<1x32xf32>
    %cst = arith.constant dense<0.000000e+00> : vector<8x32xf32>
    %3 = tpu.matmul %0, %1, %cst {dimension_numbers = #tpu.dot_dimension_numbers<[1], [0], [0], [1], [0, 0, 1, 1], [], []>} : vector<8x32xbf16>, vector<32x32xbf16>, vector<8x32xf32> -> vector<8x32xf32>
    %4 = vector.broadcast %2 : vector<1x32xf32> to vector<8x32xf32>
    %5 = arith.addf %3, %4 : vector<8x32xf32>
    %cst_5 = arith.constant 0.000000e+00 : f32
    %6 = vector.broadcast %cst_5 : f32 to vector<8x32xf32>
    %7 = arith.maximumf %5, %6 : vector<8x32xf32>
    %c0_6 = arith.constant 0 : index
    %c0_7 = arith.constant 0 : index
    %8 = vector.load %arg4[%c0_6, %c0_7] : memref<32x32xbf16, #tpu.memory_space<vmem>>, vector<32x32xbf16>
    %c0_8 = arith.constant 0 : index
    %c0_9 = arith.constant 0 : index
    %9 = vector.load %arg5[%c0_8, %c0_9] : memref<1x32xf32, #tpu.memory_space<vmem>>, vector<1x32xf32>
    %10 = arith.truncf %7 : vector<8x32xf32> to vector<8x32xbf16>
    %cst_10 = arith.constant dense<0.000000e+00> : vector<8x32xf32>
    %11 = tpu.matmul %10, %8, %cst_10 {dimension_numbers = #tpu.dot_dimension_numbers<[1], [0], [0], [1], [0, 0, 1, 1], [], []>} : vector<8x32xbf16>, vector<32x32xbf16>, vector<8x32xf32> -> vector<8x32xf32>
    %12 = vector.broadcast %9 : vector<1x32xf32> to vector<8x32xf32>
    %13 = arith.addf %11, %12 : vector<8x32xf32>
    %cst_11 = arith.constant 0.000000e+00 : f32
    %14 = vector.broadcast %cst_11 : f32 to vector<8x32xf32>
    %15 = arith.maximumf %13, %14 : vector<8x32xf32>
    %c0_12 = arith.constant 0 : index
    %c0_13 = arith.constant 0 : index
    %16 = vector.load %arg6[%c0_12, %c0_13] : memref<32x16xbf16, #tpu.memory_space<vmem>>, vector<32x16xbf16>
    %c0_14 = arith.constant 0 : index
    %c0_15 = arith.constant 0 : index
    %17 = vector.load %arg7[%c0_14, %c0_15] : memref<1x16xf32, #tpu.memory_space<vmem>>, vector<1x16xf32>
    %18 = arith.truncf %15 : vector<8x32xf32> to vector<8x32xbf16>
    %cst_16 = arith.constant dense<0.000000e+00> : vector<8x16xf32>
    %19 = tpu.matmul %18, %16, %cst_16 {dimension_numbers = #tpu.dot_dimension_numbers<[1], [0], [0], [1], [0, 0, 1, 1], [], []>} : vector<8x32xbf16>, vector<32x16xbf16>, vector<8x16xf32> -> vector<8x16xf32>
    %20 = vector.broadcast %17 : vector<1x16xf32> to vector<8x16xf32>
    %21 = arith.addf %19, %20 : vector<8x16xf32>
    %c0_17 = arith.constant 0 : index
    %c0_18 = arith.constant 0 : index
    %22 = vector.load %arg8[%c0_17, %c0_18] : memref<8x16xf32, #tpu.memory_space<vmem>>, vector<8x16xf32>
    tpu.vector_store %arg8[%c0_17, %c0_18], %21 {strides = array<i32>} : memref<8x16xf32, #tpu.memory_space<vmem>>, vector<8x16xf32>,
    return
  }
  func.func @transform_0(%arg0: i32) -> (i32, i32) {
    %c0_i32 = arith.constant 0 : i32
    %c0_i32_0 = arith.constant 0 : i32
    return %arg0, %c0_i32 : i32, i32
  }
  func.func @transform_1(%arg0: i32) -> (i32, i32) {
    %c0_i32 = arith.constant 0 : i32
    %c0_i32_0 = arith.constant 0 : i32
    %c0_i32_1 = arith.constant 0 : i32
    return %c0_i32, %c0_i32_0 : i32, i32
  }
  func.func @transform_2(%arg0: i32) -> (i32, i32) {
    %c0_i32 = arith.constant 0 : i32
    %c0_i32_0 = arith.constant 0 : i32
    %c0_i32_1 = arith.constant 0 : i32
    return %c0_i32, %c0_i32_0 : i32, i32
  }
  func.func @transform_3(%arg0: i32) -> (i32, i32) {
    %c0_i32 = arith.constant 0 : i32
    %c0_i32_0 = arith.constant 0 : i32
    %c0_i32_1 = arith.constant 0 : i32
    return %c0_i32, %c0_i32_0 : i32, i32
  }
  func.func @transform_4(%arg0: i32) -> (i32, i32) {
    %c0_i32 = arith.constant 0 : i32
    %c0_i32_0 = arith.constant 0 : i32
    %c0_i32_1 = arith.constant 0 : i32
    return %c0_i32, %c0_i32_0 : i32, i32
  }
  func.func @transform_5(%arg0: i32) -> (i32, i32) {
    %c0_i32 = arith.constant 0 : i32
    %c0_i32_0 = arith.constant 0 : i32
    %c0_i32_1 = arith.constant 0 : i32
    return %c0_i32, %c0_i32_0 : i32, i32
  }
  func.func @transform_6(%arg0: i32) -> (i32, i32) {
    %c0_i32 = arith.constant 0 : i32
    %c0_i32_0 = arith.constant 0 : i32
    %c0_i32_1 = arith.constant 0 : i32
    return %c0_i32, %c0_i32_0 : i32, i32
  }
  func.func @transform_7(%arg0: i32) -> (i32, i32) {
    %c0_i32 = arith.constant 0 : i32
    %c0_i32_0 = arith.constant 0 : i32
    return %arg0, %c0_i32 : i32, i32
  }
}

</mosaic_0001>

<bundles_post_ra>
// kernel: tpu_custom_call.1
= control target key start
LH: loop header
LB: loop body
LE: loop exit
PB: predicated region body
PF: predicated region fallthrough
CT: control target
= control target key end

     0   :  { %12 = vsyncpa [#allocation3], 0  ;;  %s1030_s0 = inlined_call_operand.hbm [shape: bf16[16,32], index: 0, kind: input, shape index: {}]   ;;  %s1031_s1 = inlined_call_operand.vmem [shape: bf16[32,32], index: 1, kind: input, shape index: {}]   ;;  %s1032_s2 = inlined_call_operand.vmem [shape: f32[1,32], index: 2, kind: input, shape index: {}]   ;;  %s1033_s3 = inlined_call_operand.vmem [shape: bf16[32,32], index: 3, kind: input, shape index: {}]   ;;  %s1034_s4 = inlined_call_operand.vmem [shape: f32[1,32], index: 4, kind: input, shape index: {}]   ;;  %s1035_s5 = inlined_call_operand.vmem [shape: bf16[32,16], index: 5, kind: input, shape index: {}]   ;;  %s1036_s6 = inlined_call_operand.vmem [shape: f32[1,16], index: 6, kind: input, shape index: {}]   ;;  %s1037_s7 = inlined_call_operand.hbm [shape: f32[16,16], index: 7, kind: output, shape index: {}]  }
   0x1   :  { %14 = vsyncpa [#allocation3 + $0x1], 0 }
   0x2   :  { %15 = vsyncpa [#allocation4], 0 }
   0x3   :  { %17 = vsyncpa [#allocation4 + $0x1], 0  ;;  %s838_s24 = smov 0   ;;  %s840_s25 = smov 0  }
   0x4   :  { %s842_s26 = smov 0   ;;  %s844_s27 = smov 0  }
   0x5 LB: > { %s859_s28 = sadd.s32 4294967295, %s792_s27   ;;  %s585_s29 = sadd.s32 4294967294, %s792_s27   ;;  %s792_s27 = sphi %s844_s27, %s1052_s27   ;;  %s788_s26 = sphi %s842_s26, %s1051_s26   ;;  %s784_s25 = sphi %s840_s25, %s1050_s25   ;;  %s780_s24 = sphi %s838_s24, %s1049_s24  }
   0x6   : > { %s863_s30 = sadd.s32 1, %s792_s27   ;;  %s30_s8 = sadd.s32 1, %s788_s26 }
   0x7   : > { %s27_s9 = ssub.s32 %s792_s27, %s863_s30  ;;  %p37_p0 = scmp.ne.s32.totalorder %s788_s26, %s784_s25 }
   0x8   : > { %p28_p1 = scmp.eq.s32.totalorder %s27_s9, 0  ;;  %p38_p2 = scmp.eq.s32.totalorder %s792_s27, 0 }
   0x9   : > { %p43_p3 = scmp.ne.s32.totalorder %s784_s25, %s780_s24  ;;  %p44_p4 = scmp.eq.s32.totalorder %s859_s28, 0 }
   0xa   : > { %s875_s10 = scalar_select %p28_p1, %s788_s26, %s30_s8  }
   0xb   : > { %p877_p5 = por %p38_p2, %p37_p0  ;;  %p881_p6 = por %p44_p4, %p43_p3 }
   0xc   : > { %p193_p7 = scmp.eq.s32.totalorder %s859_s28, 1  ;;  %p199_p8 = scmp.eq.s32.totalorder %s585_s29, 1 }
   0xd   : > { %p654_p10 = scmp.lt.s32.totalorder %s792_s27, 2  ;;  %s237_s15 = sand.u32 1, %s788_s26  }
   0xe   : > { %p888_p11 = por %p193_p7, %p37_p0  ;;  %p892_p12 = por %p199_p8, %p43_p3 }
   0xf   : > { %s589_s16 = sshll.u32 %s792_s27, 6  ;;  %s588_s17 = sshll.u32 %s237_s15, 2 }
  0x10   : > { %s1041_s13 = scalar_select %p888_p11, 1, 0 }
  0x11   : > { %s1042_s14 = scalar_select %p892_p12, 1, 0 }
  0x12   : > { %s901_s20 = scalar_lea.hbm %s1030_s0, %s589_s16  ;;  %s241_s21 = scalar_lea.vmem [#allocation2], %s588_s17 }
  0x13   : > { %s248_s22 = sshll.u32 %s241_s21, 4  ;;  %p905_p13 = pnand %p654_p10, %p877_p5  ;;  %s909_s22 = int_to_ptr.vmem [resolvable:$true] %s248_s22 }
  0x14   : > { %s238_s29 = scalar_lea.sflag [#allocation3], %s237_s15  ;;  %s696_s8 = scalar_lea.hbm %s901_s20, 64 }
  0x15   : > { %p697_p2 = scmp.ne.s32.totalorder %s901_s20, %s696_s8  ;;  %p698_p3 = pneg %p905_p13 }
  0x16   : > { %s701_s16 = scalar_lea.hbm %s1030_s0, 128  ;;  %p702_p5 = scmp.lt.u32.totalorder %s901_s20, %s1030_s0 }
  0x17   : > { %p699_p4 = pnand %p698_p3, %p697_p2  ;;  %p703_p8 = scmp.lt.u32.totalorder %s701_s16, %s696_s8 }
  0x18   : > { %p705_p9 = scmp.lt.u32.totalorder %s696_s8, %s901_s20 }
  0x19   : > { %p700_p7 = pneg %p699_p4  ;;  %p704_p10 = por %p703_p8, %p702_p5 }
  0x1b   : > { %p706_p0 = por %p705_p9, %p704_p10 }
  0x1d   : > { %p707_p1 = pnand %p706_p0, %p700_p7 }
  0x1f   : > { %710 = shalt.err (!%p707_p1)
}
  0x20   : > { %s711_s15 = scalar_lea.vmem %s909_s22, 64  ;;  %s794_s19 = smov [#allocation2]  }
  0x21   : > { %p712_p2 = scmp.ne.s32.totalorder %s909_s22, %s711_s15  ;;  %s716_s21 = sshll.u32 %s794_s19, 4  ;;  %s717_s21 = int_to_ptr.vmem [resolvable:$false] %s716_s21 }
  0x22   : > { %s718_s9 = scalar_lea.vmem %s717_s21, 128  ;;  %p719_p11 = scmp.lt.s32.totalorder %s909_s22, %s717_s21 }
  0x23   : > { %p714_p4 = pnand %p712_p2, %p698_p3  ;;  %p720_p5 = scmp.lt.s32.totalorder %s718_s9, %s711_s15 }
  0x25   : > { %p715_p12 = pneg %p714_p4  ;;  %p721_p8 = por %p720_p5, %p719_p11 }
  0x27   : > { %p722_p9 = pnand %p721_p8, %p715_p12 }
  0x29   : > { %725 = shalt.err (!%p722_p9)
}
  0x2a   : > { %649 = dma.hbm_to_vmem [thread:$0]  (!%p905_p13), %s901_s20, 64, %s909_s22, %s238_s29  }
  0x2b   : > { %p1044_p0 = scmp.lt.s32.totalorder %s792_s27, 3  ;;  %p1045_p1 = scmp.ge.s32.totalorder %s792_s27, 1 }
  0x2d   : > { %p254_p3 = pnand %p1045_p1, %p1044_p0 }
  0x2e   : > { %s943_s8 = sand.u32 (!%p254_p3), 1, %s784_s25  }
  0x2f   : > { %257 = sbr.rel (%p254_p3) target bundleno = 729 (0x2d9), region = 48  ;;  %s591_s11 = sshll.u32 (!%p254_p3), %s943_s8, 2 }
  0x30   : > { %s260_s16 = scalar_lea.sflag (!%p254_p3), [#allocation3], %s943_s8  ;;  %s263_s17 = scalar_lea.vmem (!%p254_p3), [#allocation2], %s591_s11 }
  0x36   : > { %771 = dma.done.wait (%p881_p6), %s260_s16, 64  }
  0x37   : > { %773 = vsyncadd (%p881_p6), %s260_s16, 4294967232  ;;  %v795_v0 = vmov 0.0   ;;  %vm796_vm0 = vmmov 0   ;;  %v690_v1 = vld [vmem:[%s1031_s1] sm:$0xff]   ;;  %v691_v2 = vld [vmem:[%s1031_s1 + $0x8] sm:$0xff]   ;;  %vm319_vm1 = vcmask 261120  }
  0x38   : > { %618 = vmatprep.subr.bf16.mxu0 %v795_v0  ;;  %622 = vmatprep.mubr.msk.bf16.mxu0 %vm796_vm0, %v795_v0  ;;  %v295_v3 = vld [vmem:[%s263_s17] sm:$0xf]  ;;  %v693_v5 = vld [vmem:[%s1033_s3 + $0x8] sm:$0xff]   ;;  %s592_s29 = sshll.u32 %s943_s8, 3  ;;  %s606_s15 = sshll.u32 %s859_s28, 7  ;;  %vm499_vm2 = vcmask 130048  }
  0x39   : > { %626 = vmatprep.subr.bf16.mxu1 %v795_v0  ;;  %630 = vmatprep.mubr.msk.bf16.mxu1 %vm796_vm0, %v795_v0  ;;  %v692_v4 = vld [vmem:[%s1033_s3] sm:$0xff]   ;;  %v695_v15 = vld [vmem:[%s1035_s5 + $0x8] sm:$0xff]   ;;  %s293_s19 = scalar_lea.vmem [#allocation5], %s592_s29  ;;  %s986_s16 = scalar_lea.hbm %s1037_s7, %s606_s15 }
  0x3a   : > { %619 = vmatpush3.bf16.msra.mxu0 %v690_v1  ;;  %627 = vmatpush3.bf16.msra.mxu1 %v692_v4  ;;  %v694_v6 = vld [vmem:[%s1035_s5] sm:$0xff]   ;;  %s515_s21 = sshll.u32 %s293_s19, 4  ;;  %s502_s28 = scalar_lea.sflag [#allocation4], %s943_s8  ;;  %s988_s21 = int_to_ptr.vmem [resolvable:$true] %s515_s21 }
  0x3b   : > { %620 = vmatprep.subr.bf16.mxu0 %v795_v0  ;;  %628 = vmatprep.subr.bf16.mxu1 %v795_v0  ;;  %v593_v7 = vld [vmem:[%s1032_s2] ss:$0 sm:$0xff]  ;;  %s726_s17 = scalar_lea.vmem %s988_s21, 128  ;;  %p1046_p11 = scmp.ne.s32.totalorder %s1041_s13, 0 }
  0x3c   : > { %v597_v16 = vld [vmem:[%s1034_s4] ss:$0 sm:$0xff]  ;;  %p727_p6 = scmp.ne.s32.totalorder %s988_s21, %s726_s17  ;;  %s797_s20 = smov [#allocation5]  }
  0x3d   : > { %v601_v24 = vld [vmem:[%s1036_s6] ss:$0 sm:$0xff]  ;;  %s730_s22 = sshll.u32 %s797_s20, 4  ;;  %s731_s22 = int_to_ptr.vmem [resolvable:$false] %s730_s22 }
  0x3e   : > { %621 = vmatpush3.bf16.msra.mxu0 %v691_v2  ;;  %629 = vmatpush3.bf16.msra.mxu1 %v693_v5  ;;  %p728_p12 = pnand %p727_p6, %p1046_p11  ;;  %s732_s23 = scalar_lea.vmem %s731_s22, 256 }
  0x3f   : > { %634 = vmatprep.subr.bf16.mxu0 %v795_v0  ;;  %p733_p7 = scmp.lt.s32.totalorder %s988_s21, %s731_s22  ;;  %p734_p10 = scmp.lt.s32.totalorder %s732_s23, %s726_s17 }
  0x40   : > { %p729_p13 = pneg %p728_p12 }
  0x41   : > { %623 = vmatmul.mubr.msk.bf16.vlgmr.msra.gmra.mrb[0].mxu0 %vm319_vm1, %v295_v3  ;;  %p735_p2 = por %p734_p10, %p733_p7 }
  0x42   : > { %638 = vmatprep.mubr.msk.bf16.mxu0 %vm796_vm0, %v795_v0  ;;  %635 = vmatpush3.bf16.msra.mxu0 %v694_v6 }
  0x43   : > { %636 = vmatprep.subr.bf16.mxu0 %v795_v0  ;;  %p736_p4 = pnand %p735_p2, %p729_p13 }
  0x46   : > { %637 = vmatpush3.bf16.msra.mxu0 %v695_v15 }
 0x114   : > { %v357_v8 = vpop.f32.mrb[0].mxu0 }
 0x115   : > { %v358_v9 = vadd.f32 %v593_v7, %v357_v8  ;;  %v624_v10 = vpop.f32.mrb[1].mxu0 }
 0x116   : > { %v360_v11 = vpop.f32.mrb[2].mxu0 }
 0x117   : > { %v363_v12 = vmax.f32 %v358_v9, 0.0  ;;  %v625_v13 = vpop.f32.mrb[3].mxu0 }
 0x119   : > { %v369_v14 = vpack.c.bf16 %v363_v12, %v363_v12 }
 0x11b   : > { %631 = vmatmul.mubr.msk.bf16.vlgmr.msra.gmra.mrb[0].mxu1 %vm319_vm1, %v369_v14 }
 0x1ee   : > { %v425_v17 = vpop.f32.mrb[0].mxu1 }
 0x1ef   : > { %v426_v18 = vadd.f32 %v597_v16, %v425_v17  ;;  %v632_v19 = vpop.f32.mrb[1].mxu1 }
 0x1f0   : > { %v428_v20 = vpop.f32.mrb[2].mxu1 }
 0x1f1   : > { %v431_v21 = vmax.f32 %v426_v18, 0.0  ;;  %v633_v22 = vpop.f32.mrb[3].mxu1 }
 0x1f3   : > { %v437_v23 = vpack.c.bf16 %v431_v21, %v431_v21 }
 0x1f5   : > { %639 = vmatmul.mubr.msk.bf16.vlgmr.msra.gmra.mrb[4].mxu0 %vm319_vm1, %v437_v23 }
 0x2c8   : > { %v493_v25 = vpop.f32.mrb[4].mxu0 }
 0x2c9   : > { %v494_v26 = vadd.f32 %v601_v24, %v493_v25  ;;  %v640_v27 = vpop.f32.mrb[5].mxu0 }
 0x2ca   : > { %v496_v28 = vpop.f32.mrb[6].mxu0 }
 0x2cb   : > { %v641_v29 = vpop.f32.mrb[7].mxu0  ;;  %500 = vst.msk [vmem:[%s293_s19] sm:$0xff] %vm499_vm2, %v494_v26 }
 0x2cc   : > { %739 = shalt.err (!%p736_p4)
}
 0x2cd   : > { %s740_s8 = scalar_lea.hbm %s986_s16, 128  ;;  %s744_s18 = scalar_lea.hbm %s1037_s7, 256 }
 0x2ce   : > { %p741_p5 = scmp.ne.s32.totalorder %s986_s16, %s740_s8  ;;  %p745_p0 = scmp.lt.u32.totalorder %s986_s16, %s1037_s7 }
 0x2cf   : > { %p746_p1 = scmp.lt.u32.totalorder %s744_s18, %s740_s8  ;;  %p748_p6 = scmp.lt.u32.totalorder %s740_s8, %s986_s16 }
 0x2d0   : > { %p742_p8 = pnand %p741_p5, %p1046_p11 }
 0x2d1   : > { %p747_p3 = por %p746_p1, %p745_p0 }
 0x2d2   : > { %p743_p9 = pneg %p742_p8 }
 0x2d3   : > { %p749_p12 = por %p748_p6, %p747_p3 }
 0x2d5   : > { %p750_p13 = pnand %p749_p12, %p743_p9 }
 0x2d7   : > { %753 = shalt.err (!%p750_p13)
}
 0x2d8   : > { %644 = dma.vmem_to_hbm [thread:$0]  (%p1046_p11), %s988_s21, 128, %s986_s16, %s502_s28  }
 0x2d9 PF: > { %s527_s9 = sand.u32 1, %s780_s24   ;;  %p1047_p7 = scmp.ne.s32.totalorder %s1042_s14, 0 }
 0x2da   : > { %p1048_p10 = scmp.ge.s32.totalorder %s792_s27, 2  ;;  %s528_s11 = scalar_lea.sflag [#allocation4], %s527_s9 }
 0x2dc   : > { %p651_p2 = pnand %p1048_p10, %p1047_p7 }
 0x2de   : > { %775 = dma.done.wait (!%p651_p2), %s528_s11, 128  }
 0x2df   : > { %777 = vsyncadd (!%p651_p2), %s528_s11, 4294967168  ;;  %p20_p4 = scmp.ge.s32.totalorder %s863_s30, 4   ;;  %s1049_s24 = smov %s784_s25 }
 0x2e0   : > { %s1050_s25 = smov %s788_s26  ;;  %s1051_s26 = smov %s875_s10 }
 0x2e1   : > { %s1052_s27 = smov %s863_s30  ;;  %22 = sbr.rel (!%p20_p4) target bundleno = 5 (0x5), region = 93 }
 0x2e8   :  { %533 = vsyncpa [#allocation3], 1 }
 0x2e9   :  { %535 = vsyncpa [#allocation3 + $0x1], 1 }
 0x2ea   :  { %536 = vsyncpa [#allocation4], 1 }
 0x2eb   :  { %538 = vsyncpa [#allocation4 + $0x1], 1 }

</bundles_post_ra>
